<compile_context>
chip_gen: v5e
topology: v5e:2x2
jax: 0.10.0
libtpu: 0.0.40
codegen_flags: <defaults>
</compile_context>

<pallas_src>
import jax
import jax.numpy as jnp
from jax import lax
from jax.experimental import pallas as pl
from jax.experimental.pallas import tpu as pltpu

EPS = 1e-8
LANE = 128


def _round_up(x, m):
    return (x + m - 1) // m * m


def _pick_bblk(B):
    # Amortize per-grid-step overhead, but keep >= 2 grid steps (megacore).
    for d in (8, 4, 2):
        if B % d == 0 and B // d >= 2:
            return d
    return 1


def _make_kernel(K, stride, Lout, Lout_pad, bblk, depthwise):
    need_mask = Lout_pad != Lout

    def kernel(x_ref, w_ref, b_ref, g_ref, be_ref, a_ref, o_ref):
        # x_ref : (bblk, stride, Cin, Lp)   padded input, phase-split
        # w_ref : (K, Cout, Cin) bf16  (dense)   or (C, K) f32  (depthwise)
        # b/g/be: (Cout, 1) f32
        # a_ref : (1,) f32 in SMEM (PReLU slope)
        # o_ref : (bblk, Cout, Lout_pad) f32
        slope = a_ref[0]
        wv = w_ref[...]
        bcol = b_ref[...]
        gcol = g_ref[...]
        becol = be_ref[...]
        cout = o_ref.shape[1]
        n = jnp.float32(cout * Lout)
        if need_mask:
            mask = lax.broadcasted_iota(jnp.int32, (cout, Lout_pad), 1) < Lout

        for bi in range(bblk):
            phases = [x_ref[bi, p] for p in range(stride)]
            acc = None
            for k in range(K):
                off = k // stride
                xs = phases[k % stride][:, off:off + Lout_pad]
                if depthwise:
                    t = wv[:, k:k + 1] * xs
                else:
                    t = jnp.dot(wv[k], xs.astype(jnp.bfloat16),
                                preferred_element_type=jnp.float32)
                acc = t if acc is None else acc + t
            y = acc + bcol                                   # conv + bias

            ym = jnp.where(mask, y, 0.0) if need_mask else y
            mean = jnp.sum(ym) / n                           # one-pass stats
            var = jnp.maximum(jnp.sum(ym * ym) / n - mean * mean, 0.0)
            inv = lax.rsqrt(var + EPS)
            sc = gcol * inv                                  # folded GlobLN affine
            sh = becol - sc * mean
            z = sc * y + sh
            o_ref[bi] = jnp.where(z >= 0, z, slope * z)      # PReLU

    return kernel


def conv_norm_act(x, w, b, gamma, beta, prelu_a, *, stride=1, groups=1):
    """Fused ConvNormAct forward: Conv1d(bias, 'same' pad) + GlobLN + PReLU.

    x: (B, Cin, T) f32; w: (Cout, Cin//groups, K) f32 (torch Conv1d layout);
    b, gamma, beta: (Cout,); prelu_a: scalar.
    """
    x = jnp.asarray(x, jnp.float32)
    w = jnp.asarray(w, jnp.float32)
    B, Cin, T = x.shape
    Cout, _, K = w.shape
    pad = (K - 1) // 2
    Lout = (T + 2 * pad - K) // stride + 1
    Lout_pad = _round_up(Lout, LANE)
    Lp = Lout_pad + (K - 1) // stride

    depthwise = (groups == Cin) and (Cout == Cin)
    if (not depthwise) and groups != 1:
        # General grouped conv: expand to block-diagonal dense weight (tiny).
        ci, co = Cin // groups, Cout // groups
        wd = jnp.zeros((Cout, Cin, K), jnp.float32)
        for g in range(groups):
            wd = wd.at[g * co:(g + 1) * co, g * ci:(g + 1) * ci, :].set(
                w[g * co:(g + 1) * co])
        w = wd

    # Pad once and split into `stride` phases: (B, stride, Cin, Lp).
    # Total HBM bytes ~= input size; taps are gathered in-kernel.
    total = stride * Lp
    xp = jnp.pad(x, ((0, 0), (0, 0), (pad, max(0, total - T - pad))))[:, :, :total]
    xph = xp.reshape(B, Cin, Lp, stride).transpose(0, 3, 1, 2)

    if depthwise:
        w_in = w.reshape(Cout, K)                                    # (C, K) f32
        w_spec = pl.BlockSpec((Cout, K), lambda i: (0, 0))
    else:
        w_in = jnp.transpose(w, (2, 0, 1)).astype(jnp.bfloat16)      # (K, Cout, Cin)
        w_spec = pl.BlockSpec((K, Cout, Cin), lambda i: (0, 0, 0))

    col = lambda v: jnp.asarray(v, jnp.float32).reshape(-1, 1)
    bblk = _pick_bblk(B)
    kernel = _make_kernel(K, stride, Lout, Lout_pad, bblk, depthwise)

    out = pl.pallas_call(
        kernel,
        out_shape=jax.ShapeDtypeStruct((B, Cout, Lout_pad), jnp.float32),
        grid=(B // bblk,),
        in_specs=[
            pl.BlockSpec((bblk, stride, Cin, Lp), lambda i: (i, 0, 0, 0)),
            w_spec,
            pl.BlockSpec((Cout, 1), lambda i: (0, 0)),
            pl.BlockSpec((Cout, 1), lambda i: (0, 0)),
            pl.BlockSpec((Cout, 1), lambda i: (0, 0)),
            pl.BlockSpec(memory_space=pltpu.MemorySpace.SMEM),
        ],
        out_specs=pl.BlockSpec((bblk, Cout, Lout_pad), lambda i: (i, 0, 0)),
        compiler_params=pltpu.CompilerParams(
            dimension_semantics=("parallel",),
            vmem_limit_bytes=48 * 1024 * 1024,
        ),
    )(xph, w_in, col(b), col(gamma), col(beta),
      jnp.full((1,), prelu_a, jnp.float32))

    return out[..., :Lout] if Lout_pad != Lout else out
    # TODO(synk): halo padding is still a wrapper-side jnp.pad (one extra HBM
    # copy of the activation); could be moved in-kernel with edge-tap masking.


# ---------------------------------------------------------------------------
# Pure-JAX reference (correctness check)
# ---------------------------------------------------------------------------
def _ref_conv_norm_act(x, w, b, gamma, beta, a, stride, groups):
    pad = (w.shape[-1] - 1) // 2
    y = lax.conv_general_dilated(
        x, w, window_strides=(stride,), padding=[(pad, pad)],
        dimension_numbers=("NCH", "OIH", "NCH"),
        feature_group_count=groups,
        precision=lax.Precision.HIGHEST,
    ) + b[None, :, None]
    mean = jnp.mean(y, axis=(1, 2), keepdims=True)
    var = jnp.mean((y - mean) ** 2, axis=(1, 2), keepdims=True)
    z = gamma[None, :, None] * ((y - mean) / jnp.sqrt(var + EPS)) + beta[None, :, None]
    return jnp.where(z >= 0, z, a * z)


# ---------------------------------------------------------------------------
if __name__ == "__main__":
    key = jax.random.PRNGKey(0)
    ks = jax.random.split(key, 8)

    # Config 1: dense conv (groups=1, kSize=5, stride=1) — MXU bf16 path.
    B, Cin, Cout, K, T = 2, 16, 32, 5, 128
    x1 = jax.random.normal(ks[0], (B, Cin, T), jnp.float32)
    w1 = 0.2 * jax.random.normal(ks[1], (Cout, Cin, K), jnp.float32)
    b1 = 0.1 * jax.random.normal(ks[2], (Cout,), jnp.float32)
    g1 = jnp.ones((Cout,), jnp.float32)       # GlobLN gamma init
    be1 = jnp.zeros((Cout,), jnp.float32)     # GlobLN beta init
    a1 = jnp.float32(0.25)                    # PReLU default slope

    out1 = jax.block_until_ready(conv_norm_act(x1, w1, b1, g1, be1, a1,
                                               stride=1, groups=1))
    ref1 = _ref_conv_norm_act(x1, w1, b1, g1, be1, a1, 1, 1)
    assert out1.shape == ref1.shape == (B, Cout, T)
    err1 = float(jnp.max(jnp.abs(out1 - ref1)))
    assert jnp.allclose(out1, ref1, rtol=2e-2, atol=2e-2), f"dense max err {err1}"

    # Config 2: depthwise conv (groups=C, kSize=5, stride=2) — VPU path,
    # exercises the masked-statistics / padded-lane code path (Lout=64 -> 128).
    C, T2, K2, s2 = 32, 128, 5, 2
    x2 = jax.random.normal(ks[3], (B, C, T2), jnp.float32)
    w2 = 0.3 * jax.random.normal(ks[4], (C, 1, K2), jnp.float32)
    b2 = 0.1 * jax.random.normal(ks[5], (C,), jnp.float32)
    g2 = jnp.ones((C,), jnp.float32)
    be2 = jnp.zeros((C,), jnp.float32)
    a2 = jnp.float32(0.25)

    out2 = jax.block_until_ready(conv_norm_act(x2, w2, b2, g2, be2, a2,
                                               stride=s2, groups=C))
    ref2 = _ref_conv_norm_act(x2, w2, b2, g2, be2, a2, s2, C)
    Lout2 = (T2 + 2 * ((K2 - 1) // 2) - K2) // s2 + 1
    assert out2.shape == ref2.shape == (B, C, Lout2)
    err2 = float(jnp.max(jnp.abs(out2 - ref2)))
    assert jnp.allclose(out2, ref2, rtol=2e-2, atol=2e-2), f"dw max err {err2}"

    print("KERNEL_OK")
</pallas_src>

<mosaic_0001>
module attributes {stable_mosaic.version = 11 : i64} {
  func.func @kernel(%arg0: i32, %arg1: memref<1x1x16x132xf32, #tpu.memory_space<vmem>>, %arg2: memref<5x32x16xbf16, #tpu.memory_space<vmem>>, %arg3: memref<32x1xf32, #tpu.memory_space<vmem>>, %arg4: memref<32x1xf32, #tpu.memory_space<vmem>>, %arg5: memref<32x1xf32, #tpu.memory_space<vmem>>, %arg6: memref<1xf32, #tpu.memory_space<smem>>, %arg7: memref<1x32x128xf32, #tpu.memory_space<vmem>>) attributes {dimension_semantics = [#tpu.dimension_semantics<parallel>], iteration_bounds = array<i64: 2>, scalar_prefetch = 0 : i64, scratch_operands = 0 : i64, tpu.core_type = #tpu.core_type<tc>, window_params = [{transform_indices = @transform_0, window_bounds = array<i64: 1, 1, 16, 132>}, {pipeline_mode = #tpu.pipeline_mode<synchronous>, transform_indices = @transform_1, window_bounds = array<i64: 5, 32, 16>}, {pipeline_mode = #tpu.pipeline_mode<synchronous>, transform_indices = @transform_2, window_bounds = array<i64: 32, 1>}, {pipeline_mode = #tpu.pipeline_mode<synchronous>, transform_indices = @transform_3, window_bounds = array<i64: 32, 1>}, {pipeline_mode = #tpu.pipeline_mode<synchronous>, transform_indices = @transform_4, window_bounds = array<i64: 32, 1>}, {transform_indices = @transform_5, window_bounds = array<i64: 1>}, {transform_indices = @transform_6, window_bounds = array<i64: 1, 32, 128>}]} {
    %c0 = arith.constant 0 : index
    %0 = memref.load %arg6[%c0] : memref<1xf32, #tpu.memory_space<smem>>
    %c0_0 = arith.constant 0 : index
    %c0_1 = arith.constant 0 : index
    %c0_2 = arith.constant 0 : index
    %1 = vector.load %arg2[%c0_0, %c0_1, %c0_2] : memref<5x32x16xbf16, #tpu.memory_space<vmem>>, vector<5x32x16xbf16>
    %c0_3 = arith.constant 0 : index
    %c0_4 = arith.constant 0 : index
    %2 = vector.load %arg3[%c0_3, %c0_4] : memref<32x1xf32, #tpu.memory_space<vmem>>, vector<32x1xf32>
    %c0_5 = arith.constant 0 : index
    %c0_6 = arith.constant 0 : index
    %3 = vector.load %arg4[%c0_5, %c0_6] : memref<32x1xf32, #tpu.memory_space<vmem>>, vector<32x1xf32>
    %c0_7 = arith.constant 0 : index
    %c0_8 = arith.constant 0 : index
    %4 = vector.load %arg5[%c0_7, %c0_8] : memref<32x1xf32, #tpu.memory_space<vmem>>, vector<32x1xf32>
    %c0_9 = arith.constant 0 : index
    %c0_10 = arith.constant 0 : index
    %c0_11 = arith.constant 0 : index
    %c0_12 = arith.constant 0 : index
    %5 = vector.load %arg1[%c0_9, %c0_10, %c0_11, %c0_12] : memref<1x1x16x132xf32, #tpu.memory_space<vmem>>, vector<1x1x16x132xf32>
    %6 = vector.shape_cast %5 : vector<1x1x16x132xf32> to vector<16x132xf32>
    %7 = vector.extract_strided_slice %6 {offsets = [0, 0], sizes = [16, 128], strides = [1, 1]} : vector<16x132xf32> to vector<16x128xf32>
    %8 = vector.extract_strided_slice %1 {offsets = [0, 0, 0], sizes = [1, 32, 16], strides = [1, 1, 1]} : vector<5x32x16xbf16> to vector<1x32x16xbf16>
    %9 = vector.shape_cast %8 : vector<1x32x16xbf16> to vector<32x16xbf16>
    %10 = arith.truncf %7 : vector<16x128xf32> to vector<16x128xbf16>
    %cst = arith.constant dense<0.000000e+00> : vector<32x128xf32>
    %11 = tpu.matmul %9, %10, %cst {dimension_numbers = #tpu.dot_dimension_numbers<[1], [0], [0], [1], [0, 0, 1, 1], [], []>} : vector<32x16xbf16>, vector<16x128xbf16>, vector<32x128xf32> -> vector<32x128xf32>
    %12 = vector.extract_strided_slice %6 {offsets = [0, 1], sizes = [16, 128], strides = [1, 1]} : vector<16x132xf32> to vector<16x128xf32>
    %13 = vector.extract_strided_slice %1 {offsets = [1, 0, 0], sizes = [1, 32, 16], strides = [1, 1, 1]} : vector<5x32x16xbf16> to vector<1x32x16xbf16>
    %14 = vector.shape_cast %13 : vector<1x32x16xbf16> to vector<32x16xbf16>
    %15 = arith.truncf %12 : vector<16x128xf32> to vector<16x128xbf16>
    %cst_13 = arith.constant dense<0.000000e+00> : vector<32x128xf32>
    %16 = tpu.matmul %14, %15, %cst_13 {dimension_numbers = #tpu.dot_dimension_numbers<[1], [0], [0], [1], [0, 0, 1, 1], [], []>} : vector<32x16xbf16>, vector<16x128xbf16>, vector<32x128xf32> -> vector<32x128xf32>
    %17 = arith.addf %11, %16 : vector<32x128xf32>
    %18 = vector.extract_strided_slice %6 {offsets = [0, 2], sizes = [16, 128], strides = [1, 1]} : vector<16x132xf32> to vector<16x128xf32>
    %19 = vector.extract_strided_slice %1 {offsets = [2, 0, 0], sizes = [1, 32, 16], strides = [1, 1, 1]} : vector<5x32x16xbf16> to vector<1x32x16xbf16>
    %20 = vector.shape_cast %19 : vector<1x32x16xbf16> to vector<32x16xbf16>
    %21 = arith.truncf %18 : vector<16x128xf32> to vector<16x128xbf16>
    %cst_14 = arith.constant dense<0.000000e+00> : vector<32x128xf32>
    %22 = tpu.matmul %20, %21, %cst_14 {dimension_numbers = #tpu.dot_dimension_numbers<[1], [0], [0], [1], [0, 0, 1, 1], [], []>} : vector<32x16xbf16>, vector<16x128xbf16>, vector<32x128xf32> -> vector<32x128xf32>
    %23 = arith.addf %17, %22 : vector<32x128xf32>
    %24 = vector.extract_strided_slice %6 {offsets = [0, 3], sizes = [16, 128], strides = [1, 1]} : vector<16x132xf32> to vector<16x128xf32>
    %25 = vector.extract_strided_slice %1 {offsets = [3, 0, 0], sizes = [1, 32, 16], strides = [1, 1, 1]} : vector<5x32x16xbf16> to vector<1x32x16xbf16>
    %26 = vector.shape_cast %25 : vector<1x32x16xbf16> to vector<32x16xbf16>
    %27 = arith.truncf %24 : vector<16x128xf32> to vector<16x128xbf16>
    %cst_15 = arith.constant dense<0.000000e+00> : vector<32x128xf32>
    %28 = tpu.matmul %26, %27, %cst_15 {dimension_numbers = #tpu.dot_dimension_numbers<[1], [0], [0], [1], [0, 0, 1, 1], [], []>} : vector<32x16xbf16>, vector<16x128xbf16>, vector<32x128xf32> -> vector<32x128xf32>
    %29 = arith.addf %23, %28 : vector<32x128xf32>
    %30 = vector.extract_strided_slice %6 {offsets = [0, 4], sizes = [16, 128], strides = [1, 1]} : vector<16x132xf32> to vector<16x128xf32>
    %31 = vector.extract_strided_slice %1 {offsets = [4, 0, 0], sizes = [1, 32, 16], strides = [1, 1, 1]} : vector<5x32x16xbf16> to vector<1x32x16xbf16>
    %32 = vector.shape_cast %31 : vector<1x32x16xbf16> to vector<32x16xbf16>
    %33 = arith.truncf %30 : vector<16x128xf32> to vector<16x128xbf16>
    %cst_16 = arith.constant dense<0.000000e+00> : vector<32x128xf32>
    %34 = tpu.matmul %32, %33, %cst_16 {dimension_numbers = #tpu.dot_dimension_numbers<[1], [0], [0], [1], [0, 0, 1, 1], [], []>} : vector<32x16xbf16>, vector<16x128xbf16>, vector<32x128xf32> -> vector<32x128xf32>
    %35 = arith.addf %29, %34 : vector<32x128xf32>
    %36 = vector.broadcast %2 : vector<32x1xf32> to vector<32x128xf32>
    %37 = arith.addf %35, %36 : vector<32x128xf32>
    %38 = vector.shape_cast %37 : vector<32x128xf32> to vector<1x32x128xf32>
    %cst_17 = arith.constant dense<0.000000e+00> : vector<1xf32>
    %39 = vector.multi_reduction <add>, %38, %cst_17 [1, 2] : vector<1x32x128xf32> to vector<1xf32>
    %40 = vector.shape_cast %39 : vector<1xf32> to vector<1x1x1xf32>
    %41 = vector.extract %40[0, 0, 0] : f32 from vector<1x1x1xf32>
    %cst_18 = arith.constant 4.096000e+03 : f32
    %42 = arith.divf %41, %cst_18 : f32
    %43 = arith.mulf %37, %37 : vector<32x128xf32>
    %44 = vector.shape_cast %43 : vector<32x128xf32> to vector<1x32x128xf32>
    %cst_19 = arith.constant dense<0.000000e+00> : vector<1xf32>
    %45 = vector.multi_reduction <add>, %44, %cst_19 [1, 2] : vector<1x32x128xf32> to vector<1xf32>
    %46 = vector.shape_cast %45 : vector<1xf32> to vector<1x1x1xf32>
    %47 = vector.extract %46[0, 0, 0] : f32 from vector<1x1x1xf32>
    %cst_20 = arith.constant 4.096000e+03 : f32
    %48 = arith.divf %47, %cst_20 : f32
    %49 = arith.mulf %42, %42 : f32
    %50 = arith.subf %48, %49 : f32
    %cst_21 = arith.constant 0.000000e+00 : f32
    %51 = arith.maximumf %50, %cst_21 : f32
    %cst_22 = arith.constant 9.99999993E-9 : f32
    %52 = arith.addf %51, %cst_22 : f32
    %53 = math.rsqrt %52 : f32
    %54 = vector.broadcast %53 : f32 to vector<32x1xf32>
    %55 = arith.mulf %3, %54 : vector<32x1xf32>
    %56 = vector.broadcast %42 : f32 to vector<32x1xf32>
    %57 = arith.mulf %55, %56 : vector<32x1xf32>
    %58 = arith.subf %4, %57 : vector<32x1xf32>
    %59 = vector.broadcast %55 : vector<32x1xf32> to vector<32x128xf32>
    %60 = arith.mulf %59, %37 : vector<32x128xf32>
    %61 = vector.broadcast %58 : vector<32x1xf32> to vector<32x128xf32>
    %62 = arith.addf %60, %61 : vector<32x128xf32>
    %cst_23 = arith.constant 0.000000e+00 : f32
    %63 = vector.broadcast %cst_23 : f32 to vector<32x128xf32>
    %64 = arith.cmpf oge, %62, %63 : vector<32x128xf32>
    %65 = vector.broadcast %0 : f32 to vector<32x128xf32>
    %66 = arith.mulf %65, %62 : vector<32x128xf32>
    %67 = arith.select %64, %62, %66 : vector<32x128xi1>, vector<32x128xf32>
    %c0_24 = arith.constant 0 : index
    %c0_25 = arith.constant 0 : index
    %c0_26 = arith.constant 0 : index
    %68 = vector.load %arg7[%c0_24, %c0_25, %c0_26] : memref<1x32x128xf32, #tpu.memory_space<vmem>>, vector<1x32x128xf32>
    %69 = vector.shape_cast %68 : vector<1x32x128xf32> to vector<32x128xf32>
    %70 = vector.shape_cast %67 : vector<32x128xf32> to vector<1x32x128xf32>
    tpu.vector_store %arg7[%c0_24, %c0_25, %c0_26], %70 {strides = array<i32>} : memref<1x32x128xf32, #tpu.memory_space<vmem>>, vector<1x32x128xf32>,
    return
  }
  func.func @transform_0(%arg0: i32) -> (i32, i32, i32, i32) {
    %c0_i32 = arith.constant 0 : i32
    %c0_i32_0 = arith.constant 0 : i32
    %c0_i32_1 = arith.constant 0 : i32
    %c0_i32_2 = arith.constant 0 : i32
    return %arg0, %c0_i32, %c0_i32_0, %c0_i32_1 : i32, i32, i32, i32
  }
  func.func @transform_1(%arg0: i32) -> (i32, i32, i32) {
    %c0_i32 = arith.constant 0 : i32
    %c0_i32_0 = arith.constant 0 : i32
    %c0_i32_1 = arith.constant 0 : i32
    %c0_i32_2 = arith.constant 0 : i32
    return %c0_i32, %c0_i32_0, %c0_i32_1 : i32, i32, i32
  }
  func.func @transform_2(%arg0: i32) -> (i32, i32) {
    %c0_i32 = arith.constant 0 : i32
    %c0_i32_0 = arith.constant 0 : i32
    %c0_i32_1 = arith.constant 0 : i32
    return %c0_i32, %c0_i32_0 : i32, i32
  }
  func.func @transform_3(%arg0: i32) -> (i32, i32) {
    %c0_i32 = arith.constant 0 : i32
    %c0_i32_0 = arith.constant 0 : i32
    %c0_i32_1 = arith.constant 0 : i32
    return %c0_i32, %c0_i32_0 : i32, i32
  }
  func.func @transform_4(%arg0: i32) -> (i32, i32) {
    %c0_i32 = arith.constant 0 : i32
    %c0_i32_0 = arith.constant 0 : i32
    %c0_i32_1 = arith.constant 0 : i32
    return %c0_i32, %c0_i32_0 : i32, i32
  }
  func.func @transform_5(%arg0: i32) -> i32 {
    %c0_i32 = arith.constant 0 : i32
    %c0_i32_0 = arith.constant 0 : i32
    return %c0_i32 : i32
  }
  func.func @transform_6(%arg0: i32) -> (i32, i32, i32) {
    %c0_i32 = arith.constant 0 : i32
    %c0_i32_0 = arith.constant 0 : i32
    %c0_i32_1 = arith.constant 0 : i32
    return %arg0, %c0_i32, %c0_i32_0 : i32, i32, i32
  }
}

</mosaic_0001>

<bundles_post_ra>
// kernel: tpu_custom_call.1
= control target key start
LH: loop header
LB: loop body
LE: loop exit
PB: predicated region body
PF: predicated region fallthrough
CT: control target
= control target key end

     0   :  { %s1190_s0 = inlined_call_operand.vmem [shape: f32[2,1,16,132], index: 0, kind: input, shape index: {}]   ;;  %s1191_s1 = inlined_call_operand.vmem [shape: bf16[5,32,16], index: 1, kind: input, shape index: {}]   ;;  %s1192_s2 = inlined_call_operand.vmem [shape: f32[32,1], index: 2, kind: input, shape index: {}]   ;;  %s1193_s3 = inlined_call_operand.vmem [shape: f32[32,1], index: 3, kind: input, shape index: {}]   ;;  %s1194_s4 = inlined_call_operand.vmem [shape: f32[32,1], index: 4, kind: input, shape index: {}]   ;;  %s1195_s5 = inlined_call_operand.<no memory space> [shape: f32[1], index: 5, kind: input, shape index: {}]   ;;  %s1196_s6 = inlined_call_operand.hbm [shape: f32[2,32,128], index: 6, kind: output, shape index: {}]  }
   0x1   :  { %11 = sst [smem:[#allocation2]] %s1195_s5 }
   0x2   :  { %12 = vsyncpa [#allocation4], 0 }
   0x3   :  { %14 = vsyncpa [#allocation4 + $0x1], 0  ;;  %s1001_s23 = smov 0   ;;  %s1003_s24 = smov 0  }
   0x4   :  { %s1005_s25 = smov 0   ;;  %s1007_s26 = smov 0  }
   0x5 LB: > { %s1022_s5 = sadd.s32 4294967295, %s952_s26   ;;  %s752_s27 = sadd.s32 4294967294, %s952_s26   ;;  %s952_s26 = sphi %s1007_s26, %s1202_s26   ;;  %s948_s25 = sphi %s1005_s25, %s1201_s25   ;;  %s944_s24 = sphi %s1003_s24, %s1200_s24   ;;  %s940_s23 = sphi %s1001_s23, %s1199_s23  }
   0x6   : > { %s1026_s28 = sadd.s32 1, %s952_s26   ;;  %s158_s29 = sadd.s32 1, %s948_s25 }
   0x7   : > { %s155_s30 = ssub.s32 %s952_s26, %s1026_s28  ;;  %p168_p0 = scmp.ne.s32.totalorder %s948_s25, %s944_s24 }
   0x8   : > { %p156_p1 = scmp.eq.s32.totalorder %s155_s30, 0  ;;  %p169_p2 = scmp.eq.s32.totalorder %s1022_s5, 1 }
   0x9   : > { %p174_p3 = scmp.ne.s32.totalorder %s944_s24, %s940_s23  ;;  %p175_p4 = scmp.eq.s32.totalorder %s752_s27, 1 }
   0xa   : > { %s1037_s7 = scalar_select %p156_p1, %s948_s25, %s158_s29  }
   0xb   : > { %p1039_p5 = por %p169_p2, %p168_p0  ;;  %p1043_p6 = por %p175_p4, %p174_p3 }
   0xc   : > { %p755_p7 = scmp.ge.s32.totalorder %s952_s26, 1  ;;  %p216_p8 = scmp.lt.s32.totalorder %s952_s26, 3 }
   0xe   : > { %p217_p9 = pnand %p755_p7, %p216_p8 }
   0xf   : > { %p246_p10 = scmp.lt.s32.totalorder (!%p217_p9), %s1022_s5, 1  ;;  %s954_s15 = smov (!%p217_p9), 126  }
  0x10   : > { %220 = sbr.rel (%p217_p9) target bundleno = 757 (0x2f5), region = 44  ;;  %s955_s16 = smov (!%p217_p9), 127  }
  0x11   : > { %s956_s17 = smov (!%p217_p9), 125   ;;  %s957_s18 = smov (!%p217_p9), 124  }
  0x12   : > { %s960_s22 = smov (!%p217_p9), 0.0  }
  0x15   : > { %s247_s10 = scalar_select %p246_p10, %s1022_s5, 1  ;;  %vm431_vm0 = vcmask 1022976   ;;  %v821_v9 = vld [vmem:[%s1191_s1 + $0x30] sm:$0xff]  ;;  %vm310_vm1 = vcmask 130048   ;;  %v822_v12 = vld [vmem:[%s1191_s1 + $0x38] sm:$0xff]  ;;  %vm307_vm2 = vcmask 1039360  }
  0x16   : > { %vm385_vm3 = vcmask 1031168   ;;  %v817_v17 = vld [vmem:[%s1191_s1 + $0x10] sm:$0xff]  ;;  %v818_v18 = vld [vmem:[%s1191_s1 + $0x18] sm:$0xff]  ;;  %v819_v19 = vld [vmem:[%s1191_s1 + $0x20] sm:$0xff]  ;;  %vm477_vm4 = vcmask 1014784   ;;  %v958_v22 = vmov 0  }
  0x17   : > { %s814_s11 = sshll.u32 %s247_s10, 5  ;;  %v274_v20 = vld [vmem:[%s1192_s2 + $0x8] sm:$0xff]  ;;  %v275_v21 = vld [vmem:[%s1192_s2 + $0x10] sm:$0xff]  ;;  %884 = vset.pattern.permute.xlu0 %v958_v22  ;;  %v273_v23 = vld [vmem:[%s1192_s2] sm:$0xff]  ;;  %885 = vset.pattern.permute.xlu1 %v958_v22  ;;  %s252_s10 = sld [smem:[#allocation2]] }
  0x18   : > { %s250_s14 = scalar_lea.vmem %s1190_s0, %s814_s11  ;;  %883 = vset.pattern.permute.xlu2 %v958_v22  ;;  %v276_v27 = vld [vmem:[%s1192_s2 + $0x18] sm:$0xff]  ;;  %v815_v28 = vld [vmem:[%s1191_s1] sm:$0xff]  ;;  %v820_v30 = vld [vmem:[%s1191_s1 + $0x28] sm:$0xff]  ;;  %s243_s11 = sand.u32 1, %s944_s24  }
  0x19   : > { %v285_v0 = vld [vmem:[%s250_s14] sm:$0xff]  ;;  %v287_v1 = vld [vmem:[%s250_s14 + $0x10] sm:$0xff]  ;;  %v286_v3 = vld [vmem:[%s250_s14 + $0x8] sm:$0xff]  ;;  %s756_s12 = sshll.u32 %s243_s11, 5 }
  0x1a   : > { %v289_v2 = vpack.c.bf16 %v287_v1, %v285_v0  ;;  %v288_v4 = vld [vmem:[%s250_s14 + $0x18] sm:$0xff]  ;;  %v823_v29 = vld [vmem:[%s1191_s1 + $0x40] sm:$0xff]  ;;  %v816_v31 = vld [vmem:[%s1191_s1 + $0x8] sm:$0xff]  ;;  %s245_s13 = scalar_lea.vmem [#allocation3], %s756_s12  ;;  %s825_s14 = sshll.u32 %s1022_s5, 5 }
  0x1b   : > { %v290_v5 = vpack.c.bf16 %v288_v4, %v286_v3  ;;  %v824_v32 = vld [vmem:[%s1191_s1 + $0x48] sm:$0xff]  ;;  %s675_s5 = scalar_lea.sflag [#allocation4], %s243_s11 }
  0x1c   : > { %381 = vrot.lane.b32.xlu1 %v289_v2, %s954_s15  ;;  %303 = vrot.lane.b32.xlu0 %v289_v2, %s955_s16 }
  0x1d   : > { %427 = vrot.lane.b32.xlu2 %v289_v2, %s956_s17 }
  0x24   : > { %383 = vrot.lane.b32.xlu1 %v290_v5, %s954_s15  ;;  %305 = vrot.lane.b32.xlu0 %v290_v5, %s955_s16 }
  0x25   : > { %429 = vrot.lane.b32.xlu2 %v290_v5, %s956_s17 }
  0x2c   : > { %475 = vrot.lane.b32.xlu1 %v290_v5, %s957_s18  ;;  %473 = vrot.lane.b32.xlu0 %v289_v2, %s957_s18 }
  0x2d   : > { %511 = vperm.xlu2 %883, %v273_v23   ;;  %v959_v23 = vmov 4096.0  }
  0x2e   : > { %886 = vrcp.f32 %v959_v23 }
  0x34   : > { %516 = vperm.xlu0 %884, %v274_v20   ;;  %521 = vperm.xlu1 %885, %v275_v21  }
  0x35   : > { %526 = vperm.xlu2 %883, %v276_v27  }
  0x77   : > { %v428_v6 = vpop.permute.xlu2 %427 }
  0x7f   : > { %v430_v7 = vpop.permute.xlu2 %429 }
  0x80   : > { %v432_v8 = vsel %vm431_vm0, %v428_v6, %v430_v7 }
  0x81   : > { %447 = vmatpush.bf16.msra.mxu3 %v432_v8 }
  0x84   : > { %797 = vmatmul.msk.bf16.vlgmr.msra.gmra.mxu3 %vm310_vm1, %v821_v9 }
  0x87   : > { %v512_v61 = vpop.permute.xlu2 %511 }
  0x8e   : > { %v382_v10 = vpop.permute.xlu1 %381  ;;  %v304_v11 = vpop.permute.xlu0 %303 }
  0x94   : > { %798 = vmatmul.msk.bf16.gmra.mxu3 %vm310_vm1, %v822_v12 }
  0x96   : > { %v384_v13 = vpop.permute.xlu1 %383  ;;  %v306_v14 = vpop.permute.xlu0 %305 }
  0x97   : > { %v308_v15 = vsel %vm307_vm2, %v304_v11, %v306_v14  ;;  %v386_v16 = vsel %vm385_vm3, %v382_v10, %v384_v13 }
  0x98   : > { %324 = vmatpush.bf16.msra.mxu0 %v308_v15  ;;  %826 = vmatpush.bf16.msra.mxu1 %v308_v15  ;;  %v527_v15 = vpop.permute.xlu2 %526 }
  0x99   : > { %401 = vmatpush.bf16.msra.mxu2 %v386_v16 }
  0x9b   : > { %767 = vmatmul.msk.bf16.vlgmr.msra.gmra.mxu0 %vm310_vm1, %v817_v17  ;;  %768 = vmatmul.msk.bf16.vlgmr.msra.gmra.mxu1 %vm310_vm1, %v818_v18 }
  0x9c   : > { %359 = vmatpush.bf16.msrb.mxu1 %v289_v2  ;;  %787 = vmatmul.msk.bf16.vlgmr.msra.gmra.mxu2 %vm310_vm1, %v819_v19 }
  0x9e   : > { %v476_v24 = vpop.permute.xlu1 %475  ;;  %v474_v25 = vpop.permute.xlu0 %473 }
  0x9f   : > { %v478_v26 = vsel %vm477_vm4, %v474_v25, %v476_v24  ;;  %v887_v24 = vpop.eup %886 }
  0xa0   : > { %493 = vmatpush.bf16.msrb.mxu0 %v478_v26  ;;  %v546_v25 = vmul.f32 4096.0, %v887_v24  ;;  %vm550_vm5 = vweird.f32 %v887_v24 }
  0xa2   : > { %v547_v26 = vsub.f32 1.0, %v546_v25 }
  0xa6   : > { %v517_v59 = vpop.permute.xlu0 %516  ;;  %v522_v63 = vpop.permute.xlu1 %521 }
  0xab   : > { %777 = vmatmul.msk.bf16.vlgmr.msrb.gmra.mxu1 %vm310_vm1, %v815_v28  ;;  %807 = vmatmul.msk.bf16.vlgmr.msrb.gmra.mxu0 %vm310_vm1, %v823_v29 }
  0xac   : > { %788 = vmatmul.msk.bf16.gmra.mxu2 %vm310_vm1, %v820_v30 }
  0xbb   : > { %778 = vmatmul.msk.bf16.gmra.mxu1 %vm310_vm1, %v816_v31  ;;  %808 = vmatmul.msk.bf16.gmra.mxu0 %vm310_vm1, %v824_v32  ;;  %v548_v32 = vmul.f32 %v887_v24, %v547_v26 }
 0x107   : > { %v449_v38 = vpop.f32.mrf.mxu3 }
 0x10f   : > { %v451_v42 = vpop.f32.mrf.mxu3 }
 0x117   : > { %v454_v53 = vpop.f32.mrf.mxu3 }
 0x118   : > { %v326_v33 = vpop.f32.mrf.mxu0  ;;  %v331_v34 = vpop.f32.mrf.mxu1 }
 0x11f   : > { %v403_v37 = vpop.f32.mrf.mxu2  ;;  %v456_v7 = vpop.f32.mrf.mxu3 }
 0x120   : > { %v328_v35 = vpop.f32.mrf.mxu0  ;;  %v333_v36 = vpop.f32.mrf.mxu1 }
 0x127   : > { %v405_v41 = vpop.f32.mrf.mxu2 }
 0x128   : > { %v361_v39 = vpop.f32.mrf.mxu1  ;;  %v495_v40 = vpop.f32.mrf.mxu0 }
 0x129   : > { %v362_v46 = vadd.f32 %v361_v39, %v326_v33 }
 0x12b   : > { %v413_v48 = vadd.f32 %v403_v37, %v362_v46  ;;  %v549_v37 = vadd.f32 %v887_v24, %v548_v32 }
 0x12d   : > { %v459_v54 = vadd.f32 %v449_v38, %v413_v48 }
 0x12f   : > { %v408_v49 = vpop.f32.mrf.mxu2  ;;  %v505_v60 = vadd.f32 %v495_v40, %v459_v54  ;;  %v279_v54 = vld [vmem:[%s1193_s3 + $0x10] sm:$0xff] }
 0x130   : > { %v363_v43 = vpop.f32.mrf.mxu1  ;;  %v497_v45 = vpop.f32.mrf.mxu0 }
 0x131   : > { %v364_v44 = vadd.f32 %v363_v43, %v328_v35  ;;  %v1108_v4 = vadd.f32 %v512_v61, %v505_v60  ;;  %v283_v60 = vld [vmem:[%s1194_s4 + $0x10] sm:$0xff]  ;;  %v282_v61 = vld [vmem:[%s1194_s4 + $0x8] sm:$0xff] }
 0x133   : > { %v414_v47 = vadd.f32 %v405_v41, %v364_v44  ;;  %v554_v11 = vmul.f32 %v1108_v4, %v1108_v4  ;;  %v551_v41 = vsel %vm550_vm5, %v887_v24, %v549_v37 }
 0x135   : > { %v460_v51 = vadd.f32 %v451_v42, %v414_v47 }
 0x137   : > { %v506_v57 = vadd.f32 %v497_v45, %v460_v51  ;;  %v410_v3 = vpop.f32.mrf.mxu2 }
 0x138   : > { %v366_v50 = vpop.f32.mrf.mxu1  ;;  %v500_v56 = vpop.f32.mrf.mxu0 }
 0x139   : > { %v367_v52 = vadd.f32 %v366_v50, %v331_v34  ;;  %v1106_v1 = vadd.f32 %v517_v59, %v506_v57 }
 0x13b   : > { %v415_v55 = vadd.f32 %v408_v49, %v367_v52  ;;  %v555_v8 = vmul.f32 %v1106_v1, %v1106_v1  ;;  %v533_v12 = vadd.f32 %v1106_v1, %v1108_v4  ;;  %v277_v52 = vld [vmem:[%s1193_s3] sm:$0xff] }
 0x13d   : > { %v461_v58 = vadd.f32 %v454_v53, %v415_v55  ;;  %v558_v18 = vadd.f32 %v555_v8, %v554_v11  ;;  %v278_v53 = vld [vmem:[%s1193_s3 + $0x8] sm:$0xff]  ;;  %v281_v8 = vld [vmem:[%s1194_s4] sm:$0xff]  ;;  %v284_v11 = vld [vmem:[%s1194_s4 + $0x18] sm:$0xff] }
 0x13f   : > { %v507_v62 = vadd.f32 %v500_v56, %v461_v58 }
 0x140   : > { %v368_v0 = vpop.f32.mrf.mxu1  ;;  %v502_v10 = vpop.f32.mrf.mxu0 }
 0x141   : > { %v369_v2 = vadd.f32 %v368_v0, %v333_v36  ;;  %v1110_v5 = vadd.f32 %v522_v63, %v507_v62 }
 0x143   : > { %v416_v6 = vadd.f32 %v410_v3, %v369_v2  ;;  %v556_v13 = vmul.f32 %v1110_v5, %v1110_v5  ;;  %v534_v17 = vadd.f32 %v533_v12, %v1110_v5  ;;  %v280_v3 = vld [vmem:[%s1193_s3 + $0x18] sm:$0xff] }
 0x145   : > { %v462_v9 = vadd.f32 %v456_v7, %v416_v6  ;;  %v559_v21 = vadd.f32 %v558_v18, %v556_v13  ;;  %v661_v18 = vstv %s252_s10 }
 0x147   : > { %v508_v14 = vadd.f32 %v502_v10, %v462_v9 }
 0x149   : > { %v1120_v16 = vadd.f32 %v527_v15, %v508_v14 }
 0x14b   : > { %v535_v19 = vadd.f32 %v534_v17, %v1120_v16  ;;  %v557_v20 = vmul.f32 %v1120_v16, %v1120_v16 }
 0x14d   : > { %536 = vadd.xlane.f32.xlu1 %v535_v19  ;;  %v560_v22 = vadd.f32 %v559_v21, %v557_v20 }
 0x14f   : > { %561 = vadd.xlane.f32.xlu2 %v560_v22 }
 0x1c0   : > { %v537_v27 = vpop.xlane.xlu1 %536 }
 0x1c1   : > { %v538_v28 = vrot.slane %v537_v27, 4 }
 0x1c2   : > { %v562_v29 = vpop.xlane.xlu2 %561 }
 0x1c3   : > { %v539_v30 = vadd.f32 %v538_v28, %v537_v27  ;;  %v563_v31 = vrot.slane %v562_v29, 4 }
 0x1c5   : > { %v540_v33 = vrot.slane %v539_v30, 2  ;;  %v564_v34 = vadd.f32 %v563_v31, %v562_v29 }
 0x1c7   : > { %v565_v35 = vrot.slane %v564_v34, 2  ;;  %v541_v36 = vadd.f32 %v540_v33, %v539_v30 }
 0x1c9   : > { %v542_v38 = vrot.slane %v541_v36, 1  ;;  %v566_v39 = vadd.f32 %v565_v35, %v564_v34 }
 0x1cb   : > { %v543_v40 = vadd.f32 %v542_v38, %v541_v36  ;;  %v567_v42 = vrot.slane %v566_v39, 1 }
 0x1cd   : > { %827 = vpush %v543_v40  ;;  %v568_v43 = vadd.f32 %v567_v42, %v566_v39 }
 0x1ce   : > { %829 = vpush %v551_v41 }
 0x1cf   : > { %831 = vpush %v568_v43 }
 0x1fe   : > { %s828_s15 = spop %827 }
 0x1ff   : > { %s830_s16 = spop %829 }
 0x200   : > { %s553_s17 = smul.f32 %s830_s16, %s828_s15  ;;  %s832_s18 = spop %831 }
 0x201   : > { %s578_s19 = smul.f32 %s832_s18, %s830_s16  ;;  %s686_s18 = scalar_lea.hbm %s1196_s6, %s825_s14 }
 0x202   : > { %s579_s20 = smul.f32 %s553_s17, %s553_s17  ;;  %v600_v59 = vstv %s553_s17 }
 0x204   : > { %s580_s21 = ssub.f32 %s578_s19, %s579_s20  ;;  %s687_s19 = sshll.u32 %s245_s13, 4  ;;  %s688_s19 = int_to_ptr.vmem [resolvable:$true] %s687_s19 }
 0x205   : > { %s689_s20 = sshll.u32 %s686_s18, 4  ;;  %s690_s20 = int_to_ptr.hbm [resolvable:$true] %s689_s20 }
 0x206   : > { %s581_s27 = smax.f32 %s960_s22, %s580_s21  ;;  %s904_s21 = sshra.s32 %s690_s20, 4  ;;  %s905_s21 = int_to_ptr.hbm [resolvable:$true] %s904_s21 }
 0x207   : > { %s582_s29 = sadd.f32 1e-08, %s581_s27  ;;  %s906_s17 = scalar_lea.hbm %s905_s21, 32 }
 0x208   : > { %p907_p11 = scmp.ne.s32.totalorder %s905_s21, %s906_s17  ;;  %p911_p0 = scmp.lt.s32.totalorder %s905_s21, %s1196_s6 }
 0x209   : > { %v583_v44 = vstv %s582_s29  ;;  %s910_s29 = scalar_lea.hbm %s1196_s6, 64 }
 0x20a   : > { %888 = vrsqrt.f32 %v583_v44  ;;  %vm590_vm7 = vweird.f32 %v583_v44  ;;  %p908_p12 = pnand %p907_p11, %p1039_p5  ;;  %p912_p1 = scmp.lt.s32.totalorder %s910_s29, %s906_s17 }
 0x20c   : > { %p909_p13 = pneg %p908_p12  ;;  %p913_p2 = por %p912_p1, %p911_p0 }
 0x20e   : > { %p914_p3 = pnand %p913_p2, %p909_p13 }
 0x210   : > { %v889_v45 = vpop.eup %888 }
 0x211   : > { %v585_v46 = vmul.f32 %v889_v45, %v583_v44  ;;  %vm591_vm6 = vweird.f32 %v889_v45 }
 0x212   : > { %vm592_vm8 = vmor %vm590_vm7, %vm591_vm6 }
 0x213   : > { %v586_v47 = vmul.f32 %v889_v45, %v585_v46 }
 0x215   : > { %v587_v48 = vmul.f32 0.5, %v586_v47 }
 0x217   : > { %v588_v49 = vsub.f32 1.5, %v587_v48 }
 0x219   : > { %v589_v50 = vmul.f32 %v889_v45, %v588_v49 }
 0x21b   : > { %v593_v51 = vsel %vm592_vm8, %v889_v45, %v589_v50 }
 0x21c   : > { %833 = vpush %v593_v51 }
 0x24d   : > { %s834_s15 = spop %833 }
 0x24e   : > { %v595_v55 = vstv %s834_s15 }
 0x24f   : > { %v596_v56 = vmul.f32 %v595_v55, %v277_v52  ;;  %v597_v57 = vmul.f32 %v595_v55, %v278_v53  ;;  %v598_v58 = vmul.f32 %v595_v55, %v279_v54  ;;  %v599_v6 = vmul.f32 %v595_v55, %v280_v3 }
 0x251   : > { %v602_v62 = vmul.f32 %v600_v59, %v597_v57  ;;  %v603_v63 = vmul.f32 %v600_v59, %v598_v58  ;;  %611 = vperm.xlu0 %884, %v596_v56   ;;  %v601_v7 = vmul.f32 %v600_v59, %v596_v56  ;;  %v604_v10 = vmul.f32 %v600_v59, %v599_v6 }
 0x253   : > { %v607_v0 = vsub.f32 %v283_v60, %v603_v63  ;;  %v606_v2 = vsub.f32 %v282_v61, %v602_v62  ;;  %v605_v9 = vsub.f32 %v281_v8, %v601_v7  ;;  %v608_v12 = vsub.f32 %v284_v11, %v604_v10 }
 0x255   : > { %645 = vperm.xlu1 %885, %v607_v0   ;;  %640 = vperm.xlu2 %883, %v606_v2  }
 0x259   : > { %616 = vperm.xlu0 %884, %v597_v57  }
 0x261   : > { %621 = vperm.xlu0 %884, %v598_v58  }
 0x269   : > { %626 = vperm.xlu0 %884, %v599_v6  }
 0x271   : > { %635 = vperm.xlu0 %884, %v605_v9  }
 0x279   : > { %650 = vperm.xlu0 %884, %v608_v12  }
 0x2af   : > { %v641_v17 = vpop.permute.xlu2 %640 }
 0x2c3   : > { %v612_v13 = vpop.permute.xlu0 %611 }
 0x2c4   : > { %v629_v28 = vmul.f32 %v612_v13, %v1108_v4 }
 0x2c7   : > { %v646_v24 = vpop.permute.xlu1 %645 }
 0x2cb   : > { %v617_v14 = vpop.permute.xlu0 %616 }
 0x2cc   : > { %v630_v15 = vmul.f32 %v617_v14, %v1106_v1 }
 0x2ce   : > { %v654_v19 = vadd.f32 %v641_v17, %v630_v15 }
 0x2d0   : > { %vm658_vm9 = vcmp.ge.f32.partialorder %v654_v19, 0.0  ;;  %v663_v20 = vmul.f32 %v661_v18, %v654_v19 }
 0x2d2   : > { %v667_v21 = vsel %vm658_vm9, %v654_v19, %v663_v20 }
 0x2d3   : > { %671 = vst [vmem:[%s245_s13 + $0x8] sm:$0xff] %v667_v21  ;;  %v622_v22 = vpop.permute.xlu0 %621 }
 0x2d4   : > { %v631_v23 = vmul.f32 %v622_v22, %v1110_v5 }
 0x2d6   : > { %v655_v25 = vadd.f32 %v646_v24, %v631_v23 }
 0x2d8   : > { %vm659_vm10 = vcmp.ge.f32.partialorder %v655_v25, 0.0  ;;  %v664_v26 = vmul.f32 %v661_v18, %v655_v25 }
 0x2da   : > { %v668_v27 = vsel %vm659_vm10, %v655_v25, %v664_v26 }
 0x2db   : > { %672 = vst [vmem:[%s245_s13 + $0x10] sm:$0xff] %v668_v27  ;;  %v627_v1 = vpop.permute.xlu0 %626 }
 0x2dc   : > { %v632_v5 = vmul.f32 %v627_v1, %v1120_v16 }
 0x2e3   : > { %v636_v29 = vpop.permute.xlu0 %635 }
 0x2e4   : > { %v653_v30 = vadd.f32 %v636_v29, %v629_v28 }
 0x2e6   : > { %vm657_vm11 = vcmp.ge.f32.partialorder %v653_v30, 0.0  ;;  %v662_v31 = vmul.f32 %v661_v18, %v653_v30 }
 0x2e8   : > { %v666_v32 = vsel %vm657_vm11, %v653_v30, %v662_v31 }
 0x2e9   : > { %670 = vst [vmem:[%s245_s13] sm:$0xff] %v666_v32 }
 0x2eb   : > { %v651_v33 = vpop.permute.xlu0 %650 }
 0x2ec   : > { %v656_v34 = vadd.f32 %v651_v33, %v632_v5 }
 0x2ee   : > { %vm660_vm12 = vcmp.ge.f32.partialorder %v656_v34, 0.0  ;;  %v665_v4 = vmul.f32 %v661_v18, %v656_v34 }
 0x2f0   : > { %v669_v35 = vsel %vm660_vm12, %v656_v34, %v665_v4 }
 0x2f1   : > { %673 = vst [vmem:[%s245_s13 + $0x18] sm:$0xff] %v669_v35 }
 0x2f2   : > { %917 = shalt.err (!%p914_p3)
}
 0x2f3   : > { %s961_s11 = smov 128   ;;  %s962_s12 = smov 8  }
 0x2f4   : > { %835 = dma.vmem_to_hbm [thread:$0]  (%p1039_p5), %s688_s19, 512, %s690_s20, %s675_s5, %s961_s11, %s961_s11, %s962_s12  }
 0x2f5 PF: > { %p841_p4 = scmp.ge.s32.totalorder %s952_s26, 2  ;;  %s704_s13 = sand.u32 1, %s940_s23  }
 0x2f6   : > { %s705_s14 = scalar_lea.sflag [#allocation4], %s704_s13 }
 0x2f7   : > { %p838_p7 = pnand %p841_p4, %p1043_p6 }
 0x2f9   : > { %p839_p8 = pneg %p838_p7 }
 0x2fb   : > { %935 = dma.done.wait (%p839_p8), %s705_s14, 512  }
 0x2fc   : > { %937 = vsyncadd (%p839_p8), %s705_s14, 4294966784  ;;  %p17_p9 = scmp.ge.s32.totalorder %s1026_s28, 4   ;;  %s1199_s23 = smov %s944_s24 }
 0x2fd   : > { %s1200_s24 = smov %s948_s25  ;;  %s1201_s25 = smov %s1037_s7 }
 0x2fe   : > { %s1202_s26 = smov %s1026_s28  ;;  %19 = sbr.rel (!%p17_p9) target bundleno = 5 (0x5), region = 79 }
 0x303   :  { %711 = vsyncpa [#allocation4], 1 }
 0x304   :  { %713 = vsyncpa [#allocation4 + $0x1], 1 }

</bundles_post_ra>
